<compile_context>
chip_gen: v5e
topology: v5e:2x2
jax: 0.10.0
libtpu: 0.0.40
codegen_flags: <defaults>
</compile_context>

<pallas_src>
import functools
import numpy as np
import jax
import jax.numpy as jnp
from jax.experimental import pallas as pl
from jax.experimental.pallas import tpu as pltpu

_LANE = 128
_SUBLANE = 8


def _round_up(x, m):
    return ((x + m - 1) // m) * m


def _cdiv(a, b):
    return (a + b - 1) // b


# ---------------------------------------------------------------------------
# Fused Pallas kernel: hidden Linear+ReLU stack + packed mu|var head
# ---------------------------------------------------------------------------

def _encoder_fused_kernel(*refs, num_hidden: int):
    """refs = (x, [w_i, b_i] * num_hidden, w_head, b_head, out).

    All operands are lane-dense VMEM tiles; activations never leave
    vregs/VMEM between layers.
    """
    x_ref = refs[0]
    out_ref = refs[-1]

    h = x_ref[...]                                           # [TILE_B, d_in] f32
    idx = 1
    for _ in range(num_hidden):                              # static unroll
        w_ref, b_ref = refs[idx], refs[idx + 1]
        idx += 2
        h = jnp.dot(h, w_ref[...], preferred_element_type=jnp.float32)
        h = jnp.maximum(h + b_ref[...], 0.0)                 # bias + ReLU (f32 epilogue)

    wh_ref, bh_ref = refs[idx], refs[idx + 1]                # packed mu|var head
    y = jnp.dot(h, wh_ref[...], preferred_element_type=jnp.float32) + bh_ref[...]
    out_ref[...] = y.astype(out_ref.dtype)                   # single 128-lane store


# ---------------------------------------------------------------------------
# Parameter construction (mirrors the PyTorch __init__) + lane padding
# ---------------------------------------------------------------------------

def _init_linear(key, in_size, out_size):
    """PyTorch-style default init: U(-1/sqrt(in), 1/sqrt(in)); stored [in, out]."""
    kw, kb = jax.random.split(key)
    bound = 1.0 / np.sqrt(in_size)
    w = jax.random.uniform(kw, (in_size, out_size), jnp.float32, -bound, bound)
    b = jax.random.uniform(kb, (1, out_size), jnp.float32, -bound, bound)
    return w, b


def make_encoder_params(key, input_dim, hidden_dim, latent_dim, hidden_layers, y_dim):
    dims_arr = np.linspace(hidden_dim, latent_dim, hidden_layers + 1, dtype=int)[0:-1]
    dims_arr = np.concatenate(([input_dim + y_dim], dims_arr))

    params = {"hidden": []}
    keys = jax.random.split(key, len(dims_arr) + 1)          # hidden layers + 2 heads
    for i, (in_size, out_size) in enumerate(zip(dims_arr[:-1], dims_arr[1:])):
        params["hidden"].append(_init_linear(keys[i], int(in_size), int(out_size)))
    params["mu"] = _init_linear(keys[-2], int(dims_arr[-1]), latent_dim)
    params["var"] = _init_linear(keys[-1], int(dims_arr[-1]), latent_dim)
    return params


def pad_encoder_params(params, latent_dim):
    """Lane-pad the hidden layers (output dims -> multiples of 128; the FIRST
    layer keeps its unpadded K dim so x needs no feature padding) and pack the
    mu/var heads into ONE 128-lane block: mu in lanes [:latent], var in lanes
    [latent:2*latent].  Zero-padding is exact for matmul + bias + ReLU."""
    assert 2 * latent_dim <= _LANE, "packed head assumes 2*latent_dim <= 128"

    hidden_p = []
    for li, (w, b) in enumerate(params["hidden"]):
        di, do = w.shape
        dip = di if li == 0 else _round_up(di, _LANE)        # layer-0 K stays unpadded
        dop = _round_up(do, _LANE)
        wp = jnp.zeros((dip, dop), jnp.float32).at[:di, :do].set(w)
        bp = jnp.zeros((1, dop), jnp.float32).at[:, :do].set(b)
        hidden_p.append((wp, bp))

    wm, bm = params["mu"]
    wv, bv = params["var"]
    d = wm.shape[0]
    d_pad = _round_up(d, _LANE)
    wh = jnp.zeros((d_pad, _LANE), jnp.float32)
    wh = wh.at[:d, :latent_dim].set(wm).at[:d, latent_dim:2 * latent_dim].set(wv)
    bh = jnp.zeros((1, _LANE), jnp.float32)
    bh = bh.at[:, :latent_dim].set(bm).at[:, latent_dim:2 * latent_dim].set(bv)

    return {
        "hidden": hidden_p,
        "heads": (wh, bh),
        "in_dim": params["hidden"][0][0].shape[0],
        "latent_dim": latent_dim,
    }


# ---------------------------------------------------------------------------
# Batch-tile selection (perf-review heuristic)
# ---------------------------------------------------------------------------

def _choose_tile_b(B):
    """Sublane-aligned batch tile.  Small B -> round to 8; otherwise aim for
    512-1024 rows per step while keeping >= 2 grid steps (v7x megacore)."""
    if B <= _SUBLANE:
        return _SUBLANE
    num_steps = max(2, _cdiv(B, 1024))
    return min(1024, _round_up(_cdiv(B, num_steps), _SUBLANE))


# ---------------------------------------------------------------------------
# Forward pass: one pallas_call, batch-tiled "parallel" grid
# ---------------------------------------------------------------------------

def encoder_forward(pparams, x):
    """x: [batch, input_dim + y_dim] f32 -> (mean, log_var), each [batch, latent_dim]."""
    B, d_in = x.shape
    assert d_in == pparams["in_dim"]
    latent = pparams["latent_dim"]
    num_hidden = len(pparams["hidden"])

    tile_b = _choose_tile_b(B)
    b_pad = _round_up(B, tile_b)
    grid = (b_pad // tile_b,)

    # Pad only the batch dim (feature dim stays at its true width -> no
    # inflated HBM copy of x, input DMA moves only real bytes per row).
    if b_pad != B:
        x_in = jnp.zeros((b_pad, d_in), jnp.float32).at[:B].set(x)
    else:
        x_in = x.astype(jnp.float32)

    inputs = [x_in]
    in_specs = [pl.BlockSpec((tile_b, d_in), lambda i: (i, 0))]
    for (w, b) in pparams["hidden"]:
        inputs += [w, b]
        in_specs += [pl.BlockSpec(w.shape, lambda i: (0, 0)),   # VMEM-resident weights
                     pl.BlockSpec(b.shape, lambda i: (0, 0))]
    wh, bh = pparams["heads"]
    inputs += [wh, bh]
    in_specs += [pl.BlockSpec(wh.shape, lambda i: (0, 0)),
                 pl.BlockSpec(bh.shape, lambda i: (0, 0))]

    out_dim = _LANE                                            # packed mu|var head
    out_specs = pl.BlockSpec((tile_b, out_dim), lambda i: (i, 0))

    flops = 2 * b_pad * sum(w.shape[0] * w.shape[1] for (w, _) in pparams["hidden"])
    flops += 2 * b_pad * wh.shape[0] * wh.shape[1]
    bytes_accessed = sum(int(np.prod(a.shape)) * a.dtype.itemsize for a in inputs)
    bytes_accessed += b_pad * out_dim * 4

    out = pl.pallas_call(
        functools.partial(_encoder_fused_kernel, num_hidden=num_hidden),
        out_shape=jax.ShapeDtypeStruct((b_pad, out_dim), jnp.float32),
        grid=grid,
        in_specs=in_specs,
        out_specs=out_specs,
        compiler_params=pltpu.CompilerParams(
            dimension_semantics=("parallel",),
            vmem_limit_bytes=32 * 1024 * 1024,   # ample headroom even on v7x (64 MiB)
        ),
        cost_estimate=pl.CostEstimate(
            flops=flops, transcendentals=0, bytes_accessed=bytes_accessed),
    )(*inputs)

    mean = out[:B, :latent]
    log_var = out[:B, latent:2 * latent]
    return mean, log_var


# ---------------------------------------------------------------------------
# Pure-JAX reference (unpadded) for correctness
# ---------------------------------------------------------------------------

def encoder_forward_ref(params, x):
    h = x
    for (w, b) in params["hidden"]:
        h = jnp.maximum(h @ w + b, 0.0)
    wm, bm = params["mu"]
    wv, bv = params["var"]
    return h @ wm + bm, h @ wv + bv


if __name__ == "__main__":
    # Encoder(input_dim=16, hidden_dim=32, latent_dim=8, hidden_layers=2,
    #         y_dim=4, act_type="ReLU", act_args={})
    input_dim, hidden_dim, latent_dim, hidden_layers, y_dim = 16, 32, 8, 2, 4
    batch = 2

    key = jax.random.PRNGKey(0)
    k_params, k_x = jax.random.split(key)
    params = make_encoder_params(k_params, input_dim, hidden_dim, latent_dim,
                                 hidden_layers, y_dim)
    pparams = pad_encoder_params(params, latent_dim)

    # Input already includes the concatenated one-hot label (input_dim + y_dim).
    x = jax.random.normal(k_x, (batch, input_dim + y_dim), jnp.float32)

    mean, log_var = encoder_forward(pparams, x)
    jax.block_until_ready((mean, log_var))

    mean_ref, log_var_ref = encoder_forward_ref(params, x)
    np.testing.assert_allclose(np.asarray(mean), np.asarray(mean_ref),
                               rtol=1e-5, atol=1e-5)
    np.testing.assert_allclose(np.asarray(log_var), np.asarray(log_var_ref),
                               rtol=1e-5, atol=1e-5)

    print("KERNEL_OK")
</pallas_src>

<mosaic_0001>
module attributes {stable_mosaic.version = 11 : i64} {
  func.func @_encoder_fused_kernel(%arg0: i32, %arg1: memref<8x20xf32, #tpu.memory_space<vmem>>, %arg2: memref<20x128xf32, #tpu.memory_space<vmem>>, %arg3: memref<1x128xf32, #tpu.memory_space<vmem>>, %arg4: memref<128x128xf32, #tpu.memory_space<vmem>>, %arg5: memref<1x128xf32, #tpu.memory_space<vmem>>, %arg6: memref<128x128xf32, #tpu.memory_space<vmem>>, %arg7: memref<1x128xf32, #tpu.memory_space<vmem>>, %arg8: memref<8x128xf32, #tpu.memory_space<vmem>>) attributes {dimension_semantics = [#tpu.dimension_semantics<parallel>], iteration_bounds = array<i64: 1>, scalar_prefetch = 0 : i64, scratch_operands = 0 : i64, tpu.core_type = #tpu.core_type<tc>, window_params = [{transform_indices = @transform_0, window_bounds = array<i64: 8, 20>}, {pipeline_mode = #tpu.pipeline_mode<synchronous>, transform_indices = @transform_1, window_bounds = array<i64: 20, 128>}, {pipeline_mode = #tpu.pipeline_mode<synchronous>, transform_indices = @transform_2, window_bounds = array<i64: 1, 128>}, {pipeline_mode = #tpu.pipeline_mode<synchronous>, transform_indices = @transform_3, window_bounds = array<i64: 128, 128>}, {pipeline_mode = #tpu.pipeline_mode<synchronous>, transform_indices = @transform_4, window_bounds = array<i64: 1, 128>}, {pipeline_mode = #tpu.pipeline_mode<synchronous>, transform_indices = @transform_5, window_bounds = array<i64: 128, 128>}, {pipeline_mode = #tpu.pipeline_mode<synchronous>, transform_indices = @transform_6, window_bounds = array<i64: 1, 128>}, {transform_indices = @transform_7, window_bounds = array<i64: 8, 128>}]} {
    %c0 = arith.constant 0 : index
    %c0_0 = arith.constant 0 : index
    %0 = vector.load %arg1[%c0, %c0_0] : memref<8x20xf32, #tpu.memory_space<vmem>>, vector<8x20xf32>
    %c0_1 = arith.constant 0 : index
    %c0_2 = arith.constant 0 : index
    %1 = vector.load %arg2[%c0_1, %c0_2] : memref<20x128xf32, #tpu.memory_space<vmem>>, vector<20x128xf32>
    %cst = arith.constant dense<0.000000e+00> : vector<8x128xf32>
    %2 = tpu.matmul %0, %1, %cst {dimension_numbers = #tpu.dot_dimension_numbers<[1], [0], [0], [1], [0, 0, 1, 1], [], []>} : vector<8x20xf32>, vector<20x128xf32>, vector<8x128xf32> -> vector<8x128xf32>
    %c0_3 = arith.constant 0 : index
    %c0_4 = arith.constant 0 : index
    %3 = vector.load %arg3[%c0_3, %c0_4] : memref<1x128xf32, #tpu.memory_space<vmem>>, vector<1x128xf32>
    %4 = vector.broadcast %3 : vector<1x128xf32> to vector<8x128xf32>
    %5 = arith.addf %2, %4 : vector<8x128xf32>
    %cst_5 = arith.constant 0.000000e+00 : f32
    %6 = vector.broadcast %cst_5 : f32 to vector<8x128xf32>
    %7 = arith.maximumf %5, %6 : vector<8x128xf32>
    %c0_6 = arith.constant 0 : index
    %c0_7 = arith.constant 0 : index
    %8 = vector.load %arg4[%c0_6, %c0_7] : memref<128x128xf32, #tpu.memory_space<vmem>>, vector<128x128xf32>
    %cst_8 = arith.constant dense<0.000000e+00> : vector<8x128xf32>
    %9 = tpu.matmul %7, %8, %cst_8 {dimension_numbers = #tpu.dot_dimension_numbers<[1], [0], [0], [1], [0, 0, 1, 1], [], []>} : vector<8x128xf32>, vector<128x128xf32>, vector<8x128xf32> -> vector<8x128xf32>
    %c0_9 = arith.constant 0 : index
    %c0_10 = arith.constant 0 : index
    %10 = vector.load %arg5[%c0_9, %c0_10] : memref<1x128xf32, #tpu.memory_space<vmem>>, vector<1x128xf32>
    %11 = vector.broadcast %10 : vector<1x128xf32> to vector<8x128xf32>
    %12 = arith.addf %9, %11 : vector<8x128xf32>
    %cst_11 = arith.constant 0.000000e+00 : f32
    %13 = vector.broadcast %cst_11 : f32 to vector<8x128xf32>
    %14 = arith.maximumf %12, %13 : vector<8x128xf32>
    %c0_12 = arith.constant 0 : index
    %c0_13 = arith.constant 0 : index
    %15 = vector.load %arg6[%c0_12, %c0_13] : memref<128x128xf32, #tpu.memory_space<vmem>>, vector<128x128xf32>
    %cst_14 = arith.constant dense<0.000000e+00> : vector<8x128xf32>
    %16 = tpu.matmul %14, %15, %cst_14 {dimension_numbers = #tpu.dot_dimension_numbers<[1], [0], [0], [1], [0, 0, 1, 1], [], []>} : vector<8x128xf32>, vector<128x128xf32>, vector<8x128xf32> -> vector<8x128xf32>
    %c0_15 = arith.constant 0 : index
    %c0_16 = arith.constant 0 : index
    %17 = vector.load %arg7[%c0_15, %c0_16] : memref<1x128xf32, #tpu.memory_space<vmem>>, vector<1x128xf32>
    %18 = vector.broadcast %17 : vector<1x128xf32> to vector<8x128xf32>
    %19 = arith.addf %16, %18 : vector<8x128xf32>
    %c0_17 = arith.constant 0 : index
    %c0_18 = arith.constant 0 : index
    %20 = vector.load %arg8[%c0_17, %c0_18] : memref<8x128xf32, #tpu.memory_space<vmem>>, vector<8x128xf32>
    tpu.vector_store %arg8[%c0_17, %c0_18], %19 {strides = array<i32>} : memref<8x128xf32, #tpu.memory_space<vmem>>, vector<8x128xf32>,
    return
  }
  func.func @transform_0(%arg0: i32) -> (i32, i32) {
    %c0_i32 = arith.constant 0 : i32
    %c0_i32_0 = arith.constant 0 : i32
    return %arg0, %c0_i32 : i32, i32
  }
  func.func @transform_1(%arg0: i32) -> (i32, i32) {
    %c0_i32 = arith.constant 0 : i32
    %c0_i32_0 = arith.constant 0 : i32
    %c0_i32_1 = arith.constant 0 : i32
    return %c0_i32, %c0_i32_0 : i32, i32
  }
  func.func @transform_2(%arg0: i32) -> (i32, i32) {
    %c0_i32 = arith.constant 0 : i32
    %c0_i32_0 = arith.constant 0 : i32
    %c0_i32_1 = arith.constant 0 : i32
    return %c0_i32, %c0_i32_0 : i32, i32
  }
  func.func @transform_3(%arg0: i32) -> (i32, i32) {
    %c0_i32 = arith.constant 0 : i32
    %c0_i32_0 = arith.constant 0 : i32
    %c0_i32_1 = arith.constant 0 : i32
    return %c0_i32, %c0_i32_0 : i32, i32
  }
  func.func @transform_4(%arg0: i32) -> (i32, i32) {
    %c0_i32 = arith.constant 0 : i32
    %c0_i32_0 = arith.constant 0 : i32
    %c0_i32_1 = arith.constant 0 : i32
    return %c0_i32, %c0_i32_0 : i32, i32
  }
  func.func @transform_5(%arg0: i32) -> (i32, i32) {
    %c0_i32 = arith.constant 0 : i32
    %c0_i32_0 = arith.constant 0 : i32
    %c0_i32_1 = arith.constant 0 : i32
    return %c0_i32, %c0_i32_0 : i32, i32
  }
  func.func @transform_6(%arg0: i32) -> (i32, i32) {
    %c0_i32 = arith.constant 0 : i32
    %c0_i32_0 = arith.constant 0 : i32
    %c0_i32_1 = arith.constant 0 : i32
    return %c0_i32, %c0_i32_0 : i32, i32
  }
  func.func @transform_7(%arg0: i32) -> (i32, i32) {
    %c0_i32 = arith.constant 0 : i32
    %c0_i32_0 = arith.constant 0 : i32
    return %arg0, %c0_i32 : i32, i32
  }
}

</mosaic_0001>

<bundles_post_ra>
// kernel: tpu_custom_call.1
= control target key start
LH: loop header
LB: loop body
LE: loop exit
PB: predicated region body
PF: predicated region fallthrough
CT: control target
= control target key end

     0   :  { %12 = vsyncpa [#allocation3], 0  ;;  %s437_s0 = inlined_call_operand.hbm [shape: f32[8,20], index: 0, kind: input, shape index: {}]   ;;  %s438_s1 = inlined_call_operand.hbm [shape: f32[20,128], index: 1, kind: input, shape index: {}]   ;;  %s439_s2 = inlined_call_operand.vmem [shape: f32[1,128], index: 2, kind: input, shape index: {}]   ;;  %s440_s3 = inlined_call_operand.hbm [shape: f32[128,128], index: 3, kind: input, shape index: {}]   ;;  %s441_s4 = inlined_call_operand.vmem [shape: f32[1,128], index: 4, kind: input, shape index: {}]   ;;  %s442_s5 = inlined_call_operand.hbm [shape: f32[128,128], index: 5, kind: input, shape index: {}]   ;;  %s443_s6 = inlined_call_operand.vmem [shape: f32[1,128], index: 6, kind: input, shape index: {}]   ;;  %s444_s7 = inlined_call_operand.hbm [shape: f32[8,128], index: 7, kind: output, shape index: {}]  }
   0x1   :  { %13 = vsyncpa [#allocation6], 0 }
   0x2   :  { %14 = vsyncpa [#allocation9], 0  ;;  %s31_s26 = sshll.u32 %s438_s1, 4  ;;  %s32_s26 = int_to_ptr.hbm [resolvable:$true] %s31_s26 }
   0x3   :  { %15 = vsyncpa [#allocation4], 0  ;;  %s366_s27 = smov [#allocation5]   ;;  %s21_s8 = sshll.u32 %s437_s0, 4  ;;  %s22_s8 = int_to_ptr.hbm [resolvable:$true] %s21_s8 }
   0x4   :  { %s33_s28 = sshll.u32 %s366_s27, 4  ;;  %s367_s9 = smov 128   ;;  %s34_s28 = int_to_ptr.vmem [resolvable:$true] %s33_s28 }
   0x5   :  { %s368_s10 = smov 8   ;;  %s369_s11 = smov [#allocation2]  }
   0x6   :  { %39 = dma.hbm_to_vmem [thread:$0]  %s32_s26, 384, %s34_s28, [#allocation6], %s367_s9, %s367_s9, %s368_s10  }
   0x7   :  { %s23_s12 = sshll.u32 %s369_s11, 4  ;;  %s46_s15 = sshll.u32 %s440_s3, 4  ;;  %s24_s12 = int_to_ptr.vmem [resolvable:$true] %s23_s12  ;;  %s47_s15 = int_to_ptr.hbm [resolvable:$true] %s46_s15 }
   0x8   :  { %26 = dma.hbm_to_vmem [thread:$0]  %s22_s8, 128, %s24_s12, [#allocation3]  }
   0x9   :  { %s61_s17 = sshll.u32 %s442_s5, 4  ;;  %s370_s18 = smov [#allocation7]   ;;  %s62_s17 = int_to_ptr.hbm [resolvable:$true] %s61_s17 }
   0xa   :  { %s48_s19 = sshll.u32 %s370_s18, 4  ;;  %s371_s0 = smov [#allocation8]   ;;  %s49_s19 = int_to_ptr.vmem [resolvable:$true] %s48_s19 }
   0xb   :  { %54 = dma.hbm_to_vmem [thread:$0]  %s47_s15, 2048, %s49_s19, [#allocation6], %s367_s9, %s367_s9, %s368_s10  }
   0xc   :  { %s63_s20 = sshll.u32 %s371_s0, 4  ;;  %s64_s20 = int_to_ptr.vmem [resolvable:$true] %s63_s20 }
   0xd   :  { %69 = dma.hbm_to_vmem [thread:$0]  %s62_s17, 2048, %s64_s20, [#allocation9], %s367_s9, %s367_s9, %s368_s10  }
   0xe   :  { %358 = dma.done.wait [#allocation3], 128  }
   0xf   :  { %359 = vsyncadd [#allocation3], 4294967168 }
  0x10   :  { %360 = dma.done.wait [#allocation6], 2432  }
  0x11   :  { %361 = vsyncadd [#allocation6], 4294964864 }
  0x12   :  { %362 = dma.done.wait [#allocation9], 2048  }
  0x13   :  { %363 = vsyncadd [#allocation9], 4294965248  ;;  %vm100_vm0 = vcmask 1043456   ;;  %v91_v0 = vld [vmem:[#allocation5 + $0x10] sm:$0xf]  ;;  %v90_v1 = vld [vmem:[#allocation5 + $0x8] sm:$0xff] }
  0x14   :  { %226 = vmatpush.msk.msra.mxu0 %vm100_vm0, %v91_v0  ;;  %v140_v2 = vld [vmem:[#allocation7 + $0x78] sm:$0xff]  ;;  %v139_v3 = vld [vmem:[#allocation7 + $0x70] sm:$0xff]  ;;  %v89_v4 = vld [vmem:[#allocation5] sm:$0xff]  ;;  %vm96_vm1 = vcmask 162816   ;;  %s372_s24 = smov [#allocation10]   ;;  %s214_s28 = sshll.u32 %s444_s7, 4  ;;  %s215_s28 = int_to_ptr.hbm [resolvable:$true] %s214_s28 }
  0x15   :  { %145 = vmatpush.msra.mxu1 %v140_v2  ;;  %v88_v5 = vld [vmem:[#allocation2] sm:$0xff]  ;;  %v138_v6 = vld [vmem:[#allocation7 + $0x68] sm:$0xff]  ;;  %v136_v8 = vld [vmem:[#allocation7 + $0x58] sm:$0xff]  ;;  %s212_s25 = sshll.u32 %s372_s24, 4  ;;  %s213_s25 = int_to_ptr.vmem [resolvable:$true] %s212_s25 }
  0x16   :  { %118 = vmatpush.msra.mxu0 %v90_v1  ;;  %v137_v7 = vld [vmem:[#allocation7 + $0x60] sm:$0xff]  ;;  %v135_v9 = vld [vmem:[#allocation7 + $0x50] sm:$0xff]  ;;  %v134_v10 = vld [vmem:[#allocation7 + $0x48] sm:$0xff] }
  0x17   :  { %146 = vmatpush.msra.mxu1 %v139_v3  ;;  %v133_v11 = vld [vmem:[#allocation7 + $0x40] sm:$0xff]  ;;  %v132_v12 = vld [vmem:[#allocation7 + $0x38] sm:$0xff]  ;;  %v131_v13 = vld [vmem:[#allocation7 + $0x30] sm:$0xff] }
  0x18   :  { %119 = vmatpush.msra.mxu0 %v89_v4  ;;  %v130_v14 = vld [vmem:[#allocation7 + $0x28] sm:$0xff]  ;;  %v129_v15 = vld [vmem:[#allocation7 + $0x20] sm:$0xff]  ;;  %v128_v16 = vld [vmem:[#allocation7 + $0x18] sm:$0xff] }
  0x19   :  { %227 = vmatmul.msk.f32.vlgmr.msra.gmra.mxu0 %vm96_vm1, %v88_v5  ;;  %147 = vmatpush.msra.mxu1 %v138_v6  ;;  %v127_v17 = vld [vmem:[#allocation7 + $0x10] sm:$0xff]  ;;  %v126_v18 = vld [vmem:[#allocation7 + $0x8] sm:$0xff]  ;;  %v125_v19 = vld [vmem:[#allocation7] sm:$0xff] }
  0x1a   :  { %v181_v20 = vld [vmem:[#allocation8 + $0x78] sm:$0xff]  ;;  %v180_v21 = vld [vmem:[#allocation8 + $0x70] sm:$0xff]  ;;  %v179_v22 = vld [vmem:[#allocation8 + $0x68] sm:$0xff] }
  0x1b   :  { %148 = vmatpush.msra.mxu1 %v137_v7  ;;  %186 = vmatpush.msra.mxu2 %v181_v20  ;;  %v178_v23 = vld [vmem:[#allocation8 + $0x60] sm:$0xff]  ;;  %v177_v24 = vld [vmem:[#allocation8 + $0x58] sm:$0xff]  ;;  %v176_v25 = vld [vmem:[#allocation8 + $0x50] sm:$0xff] }
  0x1c   :  { %v175_v26 = vld [vmem:[#allocation8 + $0x48] sm:$0xff]  ;;  %v174_v27 = vld [vmem:[#allocation8 + $0x40] sm:$0xff]  ;;  %v173_v28 = vld [vmem:[#allocation8 + $0x38] sm:$0xff] }
  0x1d   :  { %149 = vmatpush.msra.mxu1 %v136_v8  ;;  %187 = vmatpush.msra.mxu2 %v180_v21  ;;  %v172_v29 = vld [vmem:[#allocation8 + $0x30] sm:$0xff]  ;;  %v171_v30 = vld [vmem:[#allocation8 + $0x28] sm:$0xff]  ;;  %v170_v31 = vld [vmem:[#allocation8 + $0x20] sm:$0xff] }
  0x1e   :  { %v169_v32 = vld [vmem:[#allocation8 + $0x18] sm:$0xff]  ;;  %v235_v33 = vld [vmem:[%s439_s2] ss:$0 sm:$0xff]  ;;  %v168_v37 = vld [vmem:[#allocation8 + $0x10] sm:$0xff] }
  0x1f   :  { %150 = vmatpush.msra.mxu1 %v135_v9  ;;  %188 = vmatpush.msra.mxu2 %v179_v22  ;;  %v167_v38 = vld [vmem:[#allocation8 + $0x8] sm:$0xff]  ;;  %v166_v39 = vld [vmem:[#allocation8] sm:$0xff] }
  0x20   :  { %v236_v40 = vld [vmem:[%s441_s4] ss:$0 sm:$0xff] }
  0x21   :  { %151 = vmatpush.msra.mxu1 %v134_v10  ;;  %189 = vmatpush.msra.mxu2 %v178_v23  ;;  %v237_v44 = vld [vmem:[%s443_s6] ss:$0 sm:$0xff] }
  0x23   :  { %152 = vmatpush.msra.mxu1 %v133_v11  ;;  %190 = vmatpush.msra.mxu2 %v177_v24 }
  0x25   :  { %153 = vmatpush.msra.mxu1 %v132_v12  ;;  %191 = vmatpush.msra.mxu2 %v176_v25 }
  0x27   :  { %154 = vmatpush.msra.mxu1 %v131_v13  ;;  %192 = vmatpush.msra.mxu2 %v175_v26 }
  0x29   :  { %155 = vmatpush.msra.mxu1 %v130_v14  ;;  %193 = vmatpush.msra.mxu2 %v174_v27 }
  0x2b   :  { %156 = vmatpush.msra.mxu1 %v129_v15  ;;  %194 = vmatpush.msra.mxu2 %v173_v28 }
  0x2d   :  { %157 = vmatpush.msra.mxu1 %v128_v16  ;;  %195 = vmatpush.msra.mxu2 %v172_v29 }
  0x2f   :  { %158 = vmatpush.msra.mxu1 %v127_v17  ;;  %196 = vmatpush.msra.mxu2 %v171_v30 }
  0x31   :  { %159 = vmatpush.msra.mxu1 %v126_v18  ;;  %197 = vmatpush.msra.mxu2 %v170_v31 }
  0x33   :  { %160 = vmatpush.msra.mxu1 %v125_v19  ;;  %198 = vmatpush.msra.mxu2 %v169_v32 }
  0x35   :  { %199 = vmatpush.msra.mxu2 %v168_v37 }
  0x37   :  { %200 = vmatpush.msra.mxu2 %v167_v38 }
  0x39   :  { %201 = vmatpush.msra.mxu2 %v166_v39 }
  0x96   :  { %v121_v34 = vpop.f32.mrf.mxu0 }
  0x97   :  { %v122_v35 = vadd.f32 %v235_v33, %v121_v34 }
  0x99   :  { %v124_v36 = vmax.f32 %v122_v35, 0.0 }
  0x9b   :  { %161 = vmatmul.f32.vlgmr.msra.gmra.mxu1 %v124_v36 }
 0x118   :  { %v162_v41 = vpop.f32.mrf.mxu1 }
 0x119   :  { %v163_v42 = vadd.f32 %v236_v40, %v162_v41 }
 0x11b   :  { %v165_v43 = vmax.f32 %v163_v42, 0.0 }
 0x11d   :  { %202 = vmatmul.f32.vlgmr.msra.gmra.mxu2 %v165_v43 }
 0x1a0   :  { %v203_v45 = vpop.f32.mrf.mxu2 }
 0x1a1   :  { %v204_v46 = vadd.f32 %v237_v44, %v203_v45 }
 0x1a3   :  { %206 = vst [vmem:[#allocation10] sm:$0xff] %v204_v46 }
 0x1a4   :  { %217 = dma.vmem_to_hbm [thread:$0]  %s213_s25, 128, %s215_s28, [#allocation4]  }
 0x1a5   :  { %364 = dma.done.wait [#allocation4], 128  }
 0x1a6   :  { %365 = vsyncadd [#allocation4], 4294967168 }
 0x1a7   :  { %222 = vsyncpa [#allocation3], 1 }
 0x1a8   :  { %223 = vsyncpa [#allocation6], 1 }
 0x1a9   :  { %224 = vsyncpa [#allocation9], 1 }
 0x1aa   :  { %225 = vsyncpa [#allocation4], 1 }

</bundles_post_ra>
